<compile_context>
chip_gen: v5e
topology: v5e:2x2
jax: 0.10.0
libtpu: 0.0.40
codegen_flags: <defaults>
</compile_context>

<pallas_src>
import functools

import jax
import jax.numpy as jnp
from jax.experimental import pallas as pl
from jax.experimental.pallas import tpu as pltpu


# ----------------------------------------------------------------------------
# Pallas kernel: assemble TB prompt rows  [prefix | cls_ctx[label[b]] | suffix]
# ----------------------------------------------------------------------------
def _prompt_tile_kernel(cls_ref, prefix_ref, suffix_ref, out_ref, *, p_len, c_len, tb):
    dt = out_ref.dtype
    d = out_ref.shape[-1]
    s_len = out_ref.shape[1] - p_len - c_len
    # prefix / suffix are (1, P, D)/(1, S, D) resident blocks; broadcast across the
    # TB batch rows of this tile. The last dim (512) is lane-dense; sub-slab stores
    # along the token axis are masked vst's, which have plenty of slack here.
    out_ref[:, 0:p_len, :] = jnp.broadcast_to(prefix_ref[...], (tb, p_len, d)).astype(dt)
    out_ref[:, p_len:p_len + c_len, :] = cls_ref[...].astype(dt)
    out_ref[:, p_len + c_len:, :] = jnp.broadcast_to(suffix_ref[...], (tb, s_len, d)).astype(dt)


def build_prompts(label, cls_ctx, prefix, suffix, *, tb=16, out_dtype=None):
    """label:(B,) int, cls_ctx:(num_class,C,D), prefix:(1,P,D), suffix:(1,S,D) -> (B,P+C+S,D)."""
    B = label.shape[0]
    N, C, D = cls_ctx.shape
    P = prefix.shape[1]
    S = suffix.shape[1]
    L = P + C + S
    out_dtype = cls_ctx.dtype if out_dtype is None else out_dtype

    # Clamp labels (no OOB gather), then pre-gather the per-sample class context in XLA.
    # Only B rows (B*C*D elements, ~8 KB each) are touched; this is what lets the
    # Pallas grid be batched over TB rows per step.
    lbl = jnp.clip(label.astype(jnp.int32), 0, N - 1)
    cls_sel = jnp.take(cls_ctx, lbl, axis=0)                    # (B, C, D)

    TB = max(1, min(tb, B))
    n_tiles = pl.cdiv(B, TB)
    Bp = n_tiles * TB
    if Bp != B:
        cls_sel = jnp.pad(cls_sel, ((0, Bp - B), (0, 0), (0, 0)))

    kern = functools.partial(_prompt_tile_kernel, p_len=P, c_len=C, tb=TB)
    itemsize = jnp.dtype(out_dtype).itemsize
    out = pl.pallas_call(
        kern,
        out_shape=jax.ShapeDtypeStruct((Bp, L, D), out_dtype),
        grid_spec=pltpu.PrefetchScalarGridSpec(
            num_scalar_prefetch=0,
            grid=(n_tiles,),
            in_specs=[
                pl.BlockSpec((TB, C, D), lambda i: (i, 0, 0)),   # gathered cls ctx tile
                pl.BlockSpec((1, P, D), lambda i: (0, 0, 0)),    # prefix (resident)
                pl.BlockSpec((1, S, D), lambda i: (0, 0, 0)),    # suffix (resident)
            ],
            out_specs=pl.BlockSpec((TB, L, D), lambda i: (i, 0, 0)),
        ),
        compiler_params=pltpu.CompilerParams(
            dimension_semantics=("parallel",),                   # megacore on v7x
        ),
        cost_estimate=pl.CostEstimate(
            flops=0,
            transcendentals=0,
            bytes_accessed=int((Bp * L * D + Bp * C * D + (P + S) * D) * itemsize),
        ),
    )(cls_sel, prefix, suffix)
    return out if Bp == B else out[:B]


# ----------------------------------------------------------------------------
# Module-level forward (mode dispatch) + pure-JAX reference
# ----------------------------------------------------------------------------
def _select_buffers(params, mode):
    if mode == 'rgb':
        return params['rgb_token_prefix'], params['rgb_token_suffix']
    elif mode == 'ir':
        return params['ir_token_prefix'], params['ir_token_suffix']
    return params['token_prefix'], params['token_suffix']


def prompt_learner_forward(params, label, mode=None, tb=16):
    prefix, suffix = _select_buffers(params, mode)
    return build_prompts(label, params['cls_ctx'], prefix, suffix, tb=tb)


def prompt_learner_ref(params, label, mode=None):
    prefix, suffix = _select_buffers(params, mode)
    b = label.shape[0]
    cls_ctx = params['cls_ctx'][label]
    prefix = jnp.broadcast_to(prefix, (b,) + prefix.shape[1:])
    suffix = jnp.broadcast_to(suffix, (b,) + suffix.shape[1:])
    return jnp.concatenate([prefix, cls_ctx, suffix], axis=1)


# ----------------------------------------------------------------------------
# Deterministic synthetic parameters (shapes exactly as registered by the module)
# ----------------------------------------------------------------------------
def make_prompt_learner_params(num_class, key, ctx_dim=512, total_tokens=77,
                               rgb_n_ctx=5, ir_n_ctx=5, n_ctx=4, n_cls_ctx=4,
                               dtype=jnp.float32):
    ks = jax.random.split(key, 7)

    def emb(k, n):
        return (jax.random.normal(k, (1, n, ctx_dim), jnp.float32) * 0.02).astype(dtype)

    return {
        # nn.init.normal_(cls_vectors, std=0.02)
        'cls_ctx': (jax.random.normal(ks[0], (num_class, n_cls_ctx, ctx_dim), jnp.float32)
                    * 0.02).astype(dtype),
        'rgb_token_prefix': emb(ks[1], rgb_n_ctx + 1),
        'rgb_token_suffix': emb(ks[2], total_tokens - (rgb_n_ctx + 1) - n_cls_ctx),
        'ir_token_prefix': emb(ks[3], ir_n_ctx + 1),
        'ir_token_suffix': emb(ks[4], total_tokens - (ir_n_ctx + 1) - n_cls_ctx),
        'token_prefix': emb(ks[5], n_ctx + 1),
        'token_suffix': emb(ks[6], total_tokens - (n_ctx + 1) - n_cls_ctx),
    }


# ----------------------------------------------------------------------------
if __name__ == "__main__":
    num_class, ctx_dim, total_tokens = 8, 512, 77

    key = jax.random.PRNGKey(0)
    pkey, lkey = jax.random.split(key)
    params = make_prompt_learner_params(num_class, pkey, ctx_dim=ctx_dim,
                                        total_tokens=total_tokens)

    fwd = jax.jit(prompt_learner_forward, static_argnames=("mode", "tb"))

    # batch=2 -> single tile (TB=2); batch=6 with tb=4 -> two tiles + padding path.
    for batch in (2, 6):
        label = jax.random.randint(lkey, (batch,), 0, num_class, dtype=jnp.int32)
        for mode in ("rgb", "ir", None):
            prompts = fwd(params, label, mode=mode, tb=4)
            prompts = jax.block_until_ready(prompts)
            ref = prompt_learner_ref(params, label, mode=mode)
            assert prompts.shape == (batch, total_tokens, ctx_dim), prompts.shape
            assert bool(jnp.all(jnp.isfinite(prompts))), f"non-finite for mode={mode!r}"
            assert bool(jnp.allclose(prompts, ref, atol=1e-6)), f"mismatch for mode={mode!r}"

    print("KERNEL_OK")
</pallas_src>

<mosaic_0001>
module attributes {stable_mosaic.version = 11 : i64} {
  func.func @_prompt_tile_kernel(%arg0: i32, %arg1: memref<2x4x512xf32, #tpu.memory_space<vmem>>, %arg2: memref<1x6x512xf32, #tpu.memory_space<vmem>>, %arg3: memref<1x67x512xf32, #tpu.memory_space<vmem>>, %arg4: memref<2x77x512xf32, #tpu.memory_space<vmem>>) attributes {dimension_semantics = [#tpu.dimension_semantics<parallel>], iteration_bounds = array<i64: 1>, scalar_prefetch = 0 : i64, scratch_operands = 0 : i64, tpu.core_type = #tpu.core_type<tc>, window_params = [{transform_indices = @transform_0, window_bounds = array<i64: 2, 4, 512>}, {pipeline_mode = #tpu.pipeline_mode<synchronous>, transform_indices = @transform_1, window_bounds = array<i64: 1, 6, 512>}, {pipeline_mode = #tpu.pipeline_mode<synchronous>, transform_indices = @transform_2, window_bounds = array<i64: 1, 67, 512>}, {transform_indices = @transform_3, window_bounds = array<i64: 2, 77, 512>}]} {
    %c0 = arith.constant 0 : index
    %c0_0 = arith.constant 0 : index
    %c0_1 = arith.constant 0 : index
    %0 = vector.load %arg2[%c0, %c0_0, %c0_1] : memref<1x6x512xf32, #tpu.memory_space<vmem>>, vector<1x6x512xf32>
    %1 = vector.shape_cast %0 : vector<1x6x512xf32> to vector<1x6x512xf32>
    %2 = vector.broadcast %1 : vector<1x6x512xf32> to vector<2x6x512xf32>
    %c0_2 = arith.constant 0 : index
    %c0_3 = arith.constant 0 : index
    %c0_4 = arith.constant 0 : index
    %3 = vector.load %arg4[%c0_2, %c0_3, %c0_4] : memref<2x77x512xf32, #tpu.memory_space<vmem>>, vector<2x6x512xf32>
    tpu.vector_store %arg4[%c0_2, %c0_3, %c0_4], %2 {strides = array<i32>} : memref<2x77x512xf32, #tpu.memory_space<vmem>>, vector<2x6x512xf32>,
    %c0_5 = arith.constant 0 : index
    %c0_6 = arith.constant 0 : index
    %c0_7 = arith.constant 0 : index
    %4 = vector.load %arg1[%c0_5, %c0_6, %c0_7] : memref<2x4x512xf32, #tpu.memory_space<vmem>>, vector<2x4x512xf32>
    %c0_8 = arith.constant 0 : index
    %c6 = arith.constant 6 : index
    %c0_9 = arith.constant 0 : index
    %5 = vector.load %arg4[%c0_8, %c6, %c0_9] : memref<2x77x512xf32, #tpu.memory_space<vmem>>, vector<2x4x512xf32>
    tpu.vector_store %arg4[%c0_8, %c6, %c0_9], %4 {strides = array<i32>} : memref<2x77x512xf32, #tpu.memory_space<vmem>>, vector<2x4x512xf32>,
    %c0_10 = arith.constant 0 : index
    %c0_11 = arith.constant 0 : index
    %c0_12 = arith.constant 0 : index
    %6 = vector.load %arg3[%c0_10, %c0_11, %c0_12] : memref<1x67x512xf32, #tpu.memory_space<vmem>>, vector<1x67x512xf32>
    %7 = vector.shape_cast %6 : vector<1x67x512xf32> to vector<1x67x512xf32>
    %8 = vector.broadcast %7 : vector<1x67x512xf32> to vector<2x67x512xf32>
    %c0_13 = arith.constant 0 : index
    %c10 = arith.constant 10 : index
    %c0_14 = arith.constant 0 : index
    %9 = vector.load %arg4[%c0_13, %c10, %c0_14] : memref<2x77x512xf32, #tpu.memory_space<vmem>>, vector<2x67x512xf32>
    tpu.vector_store %arg4[%c0_13, %c10, %c0_14], %8 {strides = array<i32>} : memref<2x77x512xf32, #tpu.memory_space<vmem>>, vector<2x67x512xf32>,
    return
  }
  func.func @transform_0(%arg0: i32) -> (i32, i32, i32) {
    %c0_i32 = arith.constant 0 : i32
    %c0_i32_0 = arith.constant 0 : i32
    %c0_i32_1 = arith.constant 0 : i32
    return %arg0, %c0_i32, %c0_i32_0 : i32, i32, i32
  }
  func.func @transform_1(%arg0: i32) -> (i32, i32, i32) {
    %c0_i32 = arith.constant 0 : i32
    %c0_i32_0 = arith.constant 0 : i32
    %c0_i32_1 = arith.constant 0 : i32
    %c0_i32_2 = arith.constant 0 : i32
    return %c0_i32, %c0_i32_0, %c0_i32_1 : i32, i32, i32
  }
  func.func @transform_2(%arg0: i32) -> (i32, i32, i32) {
    %c0_i32 = arith.constant 0 : i32
    %c0_i32_0 = arith.constant 0 : i32
    %c0_i32_1 = arith.constant 0 : i32
    %c0_i32_2 = arith.constant 0 : i32
    return %c0_i32, %c0_i32_0, %c0_i32_1 : i32, i32, i32
  }
  func.func @transform_3(%arg0: i32) -> (i32, i32, i32) {
    %c0_i32 = arith.constant 0 : i32
    %c0_i32_0 = arith.constant 0 : i32
    %c0_i32_1 = arith.constant 0 : i32
    return %arg0, %c0_i32, %c0_i32_0 : i32, i32, i32
  }
}

</mosaic_0001>

<bundles_post_ra>
// kernel: prompt_learner_forward.1
= control target key start
LH: loop header
LB: loop body
LE: loop exit
PB: predicated region body
PF: predicated region fallthrough
CT: control target
= control target key end

     0   :  { %vm153_vm0 = vcmask 1041408   ;;  %s806_s0 = inlined_call_operand.vmem [shape: f32[2,4,512], index: 0, kind: input, shape index: {}]   ;;  %s807_s1 = inlined_call_operand.vmem [shape: f32[1,6,512], index: 1, kind: input, shape index: {}]   ;;  %s808_s3 = inlined_call_operand.vmem [shape: f32[2,77,512], index: 3, kind: output, shape index: {}]   ;;  %s809_s2 = inlined_call_operand.vmem [shape: f32[1,67,512], index: 2, kind: input, shape index: {}]  }
   0x1   :  { %v26_v0 = vld [vmem:[%s806_s0] sm:$0xff]  ;;  %v27_v1 = vld [vmem:[%s806_s0 + $0x8] sm:$0xff]  ;;  %v28_v2 = vld [vmem:[%s806_s0 + $0x10] sm:$0xff] }
   0x2   :  { %34 = vst [vmem:[#allocation1] ss:$2 sm:$0xff] %v26_v0  ;;  %v29_v3 = vld [vmem:[%s806_s0 + $0x18] sm:$0xff]  ;;  %v14_v4 = vld [vmem:[%s807_s1] sm:$0x3f]  ;;  %v82_v25 = vld [vmem:[%s809_s2 + $0x8] sm:$0xff] }
   0x3   :  { %36 = vst [vmem:[#allocation1 + $0x10] ss:$2 sm:$0xff] %v27_v1  ;;  %v15_v5 = vld [vmem:[%s807_s1 + $0x8] sm:$0x3f]  ;;  %v16_v6 = vld [vmem:[%s807_s1 + $0x10] sm:$0x3f] }
   0x4   :  { %42 = vst [vmem:[#allocation1 + $0x20] ss:$2 sm:$0xff] %v28_v2  ;;  %v17_v7 = vld [vmem:[%s807_s1 + $0x18] sm:$0x3f]  ;;  %v81_v23 = vld [vmem:[%s809_s2] sm:$0xff]  ;;  %v83_v27 = vld [vmem:[%s809_s2 + $0x10] sm:$0xff] }
   0x5   :  { %44 = vst [vmem:[#allocation1 + $0x30] ss:$2 sm:$0xff] %v29_v3  ;;  %v154_v26 = vrot.slane %v81_v23, 6  ;;  %v155_v28 = vrot.slane %v82_v25, 6  ;;  %v85_v29 = vld [vmem:[%s809_s2 + $0x20] sm:$0xff]  ;;  %v84_v30 = vld [vmem:[%s809_s2 + $0x18] sm:$0xff] }
   0x6   :  { %18 = vst [vmem:[%s808_s3] sm:$0x3f] %v14_v4  ;;  %v156_v31 = vrot.slane %v83_v27, 6  ;;  %v86_v32 = vld [vmem:[%s809_s2 + $0x28] sm:$0xff]  ;;  %v158_v33 = vrot.slane %v85_v29, 6  ;;  %v157_v34 = vrot.slane %v84_v30, 6  ;;  %v87_v35 = vld [vmem:[%s809_s2 + $0x30] sm:$0xff] }
   0x7   :  { %22 = vst [vmem:[%s808_s3 + $0x140] sm:$0x3f] %v14_v4  ;;  %v160_v36 = vrot.slane %v86_v32, 6  ;;  %v88_v37 = vld [vmem:[%s809_s2 + $0x38] sm:$0xff]  ;;  %v162_v39 = vrot.slane %v87_v35, 6  ;;  %v89_v40 = vld [vmem:[%s809_s2 + $0x40] sm:$0xff] }
   0x8   :  { %19 = vst [vmem:[%s808_s3 + $0x8] sm:$0x3f] %v15_v5  ;;  %v159_v38 = vsel %vm153_vm0, %v154_v26, %v158_v33  ;;  %v164_v42 = vrot.slane %v88_v37, 6  ;;  %v90_v43 = vld [vmem:[%s809_s2 + $0x48] sm:$0xff]  ;;  %v166_v45 = vrot.slane %v89_v40, 6  ;;  %v91_v46 = vld [vmem:[%s809_s2 + $0x50] sm:$0xff] }
   0x9   :  { %23 = vst [vmem:[%s808_s3 + $0x148] sm:$0x3f] %v15_v5  ;;  %v37_v8 = vld.sshfl [vmem:[#allocation1] sm:$0xff pattern:$0x75316420]  ;;  %v161_v41 = vsel %vm153_vm0, %v155_v28, %v160_v36  ;;  %v163_v44 = vsel %vm153_vm0, %v156_v31, %v162_v39  ;;  %v168_v48 = vrot.slane %v90_v43, 6 }
   0xa   :  { %20 = vst [vmem:[%s808_s3 + $0x10] sm:$0x3f] %v16_v6  ;;  %v49_v9 = vrot.slane %v37_v8, 2  ;;  %v38_v10 = vld.sshfl [vmem:[#allocation1 + $0x8] sm:$0xff pattern:$0x75316420]  ;;  %v165_v47 = vsel %vm153_vm0, %v157_v34, %v164_v42  ;;  %v167_v50 = vsel %vm153_vm0, %v158_v33, %v166_v45 }
   0xb   :  { %24 = vst [vmem:[%s808_s3 + $0x150] sm:$0x3f] %v16_v6  ;;  %v39_v11 = vld.sshfl [vmem:[#allocation1 + $0x10] sm:$0xff pattern:$0x75316420]  ;;  %v50_v12 = vrot.slane %v38_v10, 2  ;;  %v169_v53 = vsel %vm153_vm0, %v160_v36, %v168_v48 }
   0xc   :  { %21 = vst [vmem:[%s808_s3 + $0x18] sm:$0x3f] %v17_v7  ;;  %v40_v13 = vld.sshfl [vmem:[#allocation1 + $0x18] sm:$0xff pattern:$0x75316420]  ;;  %v51_v14 = vrot.slane %v39_v11, 2 }
   0xd   :  { %25 = vst [vmem:[%s808_s3 + $0x158] sm:$0x3f] %v17_v7  ;;  %v45_v15 = vld.sshfl [vmem:[#allocation1 + $0x20] sm:$0xff pattern:$0x75316420]  ;;  %v52_v16 = vrot.slane %v40_v13, 2 }
   0xe   :  { %65 = vst [vmem:[%s808_s3] sm:$0xc0] %v49_v9  ;;  %v46_v17 = vld.sshfl [vmem:[#allocation1 + $0x28] sm:$0xff pattern:$0x75316420]  ;;  %v53_v18 = vrot.slane %v45_v15, 2  ;;  %v92_v49 = vld [vmem:[%s809_s2 + $0x58] sm:$0xff] }
   0xf   :  { %69 = vst [vmem:[%s808_s3 + $0x20] sm:$0x3] %v49_v9  ;;  %v47_v19 = vld.sshfl [vmem:[#allocation1 + $0x30] sm:$0xff pattern:$0x75316420]  ;;  %v54_v20 = vrot.slane %v46_v17, 2 }
  0x10   :  { %66 = vst [vmem:[%s808_s3 + $0x8] sm:$0xc0] %v50_v12  ;;  %v48_v21 = vld.sshfl [vmem:[#allocation1 + $0x38] sm:$0xff pattern:$0x75316420]  ;;  %v55_v22 = vrot.slane %v47_v19, 2 }
  0x11   :  { %70 = vst [vmem:[%s808_s3 + $0x28] sm:$0x3] %v50_v12  ;;  %v56_v24 = vrot.slane %v48_v21, 2  ;;  %v170_v51 = vrot.slane %v91_v46, 6  ;;  %v93_v52 = vld [vmem:[%s809_s2 + $0x60] sm:$0xff]  ;;  %v172_v54 = vrot.slane %v92_v49, 6 }
  0x12   :  { %67 = vst [vmem:[%s808_s3 + $0x10] sm:$0xc0] %v51_v14  ;;  %v94_v55 = vld [vmem:[%s809_s2 + $0x68] sm:$0xff]  ;;  %v174_v57 = vrot.slane %v93_v52, 6  ;;  %v95_v58 = vld [vmem:[%s809_s2 + $0x70] sm:$0xff]  ;;  %v96_v61 = vld [vmem:[%s809_s2 + $0x78] sm:$0xff] }
  0x13   :  { %71 = vst [vmem:[%s808_s3 + $0x30] sm:$0x3] %v51_v14  ;;  %v171_v56 = vsel %vm153_vm0, %v162_v39, %v170_v51  ;;  %v173_v59 = vsel %vm153_vm0, %v164_v42, %v172_v54  ;;  %v176_v60 = vrot.slane %v94_v55, 6  ;;  %v178_v63 = vrot.slane %v95_v58, 6  ;;  %v97_v0 = vld [vmem:[%s809_s2 + $0x80] sm:$0xff]  ;;  %v98_v3 = vld [vmem:[%s809_s2 + $0x88] sm:$0xff] }
  0x14   :  { %68 = vst [vmem:[%s808_s3 + $0x18] sm:$0xc0] %v52_v16  ;;  %v175_v62 = vsel %vm153_vm0, %v166_v45, %v174_v57  ;;  %v180_v2 = vrot.slane %v96_v61, 6  ;;  %v182_v5 = vrot.slane %v97_v0, 6  ;;  %v99_v6 = vld [vmem:[%s809_s2 + $0x90] sm:$0xff]  ;;  %v184_v8 = vrot.slane %v98_v3, 6 }
  0x15   :  { %72 = vst [vmem:[%s808_s3 + $0x38] sm:$0x3] %v52_v16  ;;  %v177_v1 = vsel %vm153_vm0, %v168_v48, %v176_v60  ;;  %v179_v4 = vsel %vm153_vm0, %v170_v51, %v178_v63  ;;  %v100_v9 = vld [vmem:[%s809_s2 + $0x98] sm:$0xff]  ;;  %v186_v11 = vrot.slane %v99_v6, 6  ;;  %v101_v12 = vld [vmem:[%s809_s2 + $0xa0] sm:$0xff]  ;;  %v102_v15 = vld [vmem:[%s809_s2 + $0xa8] sm:$0xff] }
  0x16   :  { %73 = vst [vmem:[%s808_s3 + $0x140] sm:$0xc0] %v53_v18  ;;  %v181_v7 = vsel %vm153_vm0, %v172_v54, %v180_v2  ;;  %v183_v10 = vsel %vm153_vm0, %v174_v57, %v182_v5  ;;  %v185_v13 = vsel %vm153_vm0, %v176_v60, %v184_v8  ;;  %v188_v14 = vrot.slane %v100_v9, 6  ;;  %v104_v21 = vld [vmem:[%s809_s2 + $0xb8] sm:$0xff]  ;;  %v106_v27 = vld [vmem:[%s809_s2 + $0xc8] sm:$0xff]  ;;  %v107_v30 = vld [vmem:[%s809_s2 + $0xd0] sm:$0xff] }
  0x17   :  { %77 = vst [vmem:[%s808_s3 + $0x160] sm:$0x3] %v53_v18  ;;  %v187_v16 = vsel %vm153_vm0, %v178_v63, %v186_v11  ;;  %v190_v17 = vrot.slane %v101_v12, 6  ;;  %v103_v18 = vld [vmem:[%s809_s2 + $0xb0] sm:$0xff]  ;;  %v200_v32 = vrot.slane %v106_v27, 6  ;;  %v108_v33 = vld [vmem:[%s809_s2 + $0xd8] sm:$0xff] }
  0x18   :  { %74 = vst [vmem:[%s808_s3 + $0x148] sm:$0xc0] %v54_v20  ;;  %v189_v19 = vsel %vm153_vm0, %v180_v2, %v188_v14  ;;  %v194_v23 = vrot.slane %v103_v18, 6  ;;  %v202_v35 = vrot.slane %v107_v30, 6  ;;  %v109_v36 = vld [vmem:[%s809_s2 + $0xe0] sm:$0xff]  ;;  %v110_v39 = vld [vmem:[%s809_s2 + $0xe8] sm:$0xff] }
  0x19   :  { %78 = vst [vmem:[%s808_s3 + $0x168] sm:$0x3] %v54_v20  ;;  %v192_v20 = vrot.slane %v102_v15, 6  ;;  %v111_v42 = vld [vmem:[%s809_s2 + $0xf0] sm:$0xff]  ;;  %v112_v45 = vld [vmem:[%s809_s2 + $0xf8] sm:$0xff] }
  0x1a   :  { %75 = vst [vmem:[%s808_s3 + $0x150] sm:$0xc0] %v55_v22  ;;  %v203_v40 = vsel %vm153_vm0, %v194_v23, %v202_v35  ;;  %v113_v48 = vld [vmem:[%s809_s2 + $0x100] sm:$0x7]  ;;  %v114_v51 = vld [vmem:[%s809_s2 + $0x108] sm:$0x7] }
  0x1b   :  { %79 = vst [vmem:[%s808_s3 + $0x170] sm:$0x3] %v55_v22  ;;  %v191_v22 = vsel %vm153_vm0, %v182_v5, %v190_v17  ;;  %v193_v25 = vsel %vm153_vm0, %v184_v8, %v192_v20  ;;  %v201_v37 = vsel %vm153_vm0, %v192_v20, %v200_v32  ;;  %v115_v54 = vld [vmem:[%s809_s2 + $0x110] sm:$0x7]  ;;  %v116_v57 = vld [vmem:[%s809_s2 + $0x118] sm:$0x7] }
  0x1c   :  { %76 = vst [vmem:[%s808_s3 + $0x158] sm:$0xc0] %v56_v24  ;;  %v220_v61 = vrot.slane %v116_v57, 6 }
  0x1d   :  { %80 = vst [vmem:[%s808_s3 + $0x178] sm:$0x3] %v56_v24  ;;  %v105_v24 = vld [vmem:[%s809_s2 + $0xc0] sm:$0xff] }
  0x1e   :  { %258 = vst [vmem:[%s808_s3 + $0x20] sm:$0xfc] %v154_v26  ;;  %v198_v29 = vrot.slane %v105_v24, 6 }
  0x1f   :  { %294 = vst [vmem:[%s808_s3 + $0x160] sm:$0xfc] %v154_v26  ;;  %v196_v26 = vrot.slane %v104_v21, 6 }
  0x20   :  { %259 = vst [vmem:[%s808_s3 + $0x28] sm:$0xfc] %v155_v28 }
  0x21   :  { %295 = vst [vmem:[%s808_s3 + $0x168] sm:$0xfc] %v155_v28  ;;  %v195_v28 = vsel %vm153_vm0, %v186_v11, %v194_v23 }
  0x22   :  { %260 = vst [vmem:[%s808_s3 + $0x30] sm:$0xfc] %v156_v31 }
  0x23   :  { %296 = vst [vmem:[%s808_s3 + $0x170] sm:$0xfc] %v156_v31  ;;  %v197_v31 = vsel %vm153_vm0, %v188_v14, %v196_v26 }
  0x24   :  { %261 = vst [vmem:[%s808_s3 + $0x38] sm:$0xfc] %v157_v34 }
  0x25   :  { %297 = vst [vmem:[%s808_s3 + $0x178] sm:$0xfc] %v157_v34  ;;  %v199_v34 = vsel %vm153_vm0, %v190_v17, %v198_v29 }
  0x26   :  { %262 = vst [vmem:[%s808_s3 + $0x40] sm:$0xff] %v159_v38 }
  0x27   :  { %298 = vst [vmem:[%s808_s3 + $0x180] sm:$0xff] %v159_v38  ;;  %v204_v38 = vrot.slane %v108_v33, 6 }
  0x28   :  { %263 = vst [vmem:[%s808_s3 + $0x48] sm:$0xff] %v161_v41 }
  0x29   :  { %299 = vst [vmem:[%s808_s3 + $0x188] sm:$0xff] %v161_v41  ;;  %v206_v41 = vrot.slane %v109_v36, 6  ;;  %v205_v43 = vsel %vm153_vm0, %v196_v26, %v204_v38 }
  0x2a   :  { %264 = vst [vmem:[%s808_s3 + $0x50] sm:$0xff] %v163_v44 }
  0x2b   :  { %300 = vst [vmem:[%s808_s3 + $0x190] sm:$0xff] %v163_v44  ;;  %v208_v44 = vrot.slane %v110_v39, 6  ;;  %v207_v46 = vsel %vm153_vm0, %v198_v29, %v206_v41 }
  0x2c   :  { %265 = vst [vmem:[%s808_s3 + $0x58] sm:$0xff] %v165_v47 }
  0x2d   :  { %301 = vst [vmem:[%s808_s3 + $0x198] sm:$0xff] %v165_v47  ;;  %v210_v47 = vrot.slane %v111_v42, 6  ;;  %v209_v49 = vsel %vm153_vm0, %v200_v32, %v208_v44 }
  0x2e   :  { %266 = vst [vmem:[%s808_s3 + $0x60] sm:$0xff] %v167_v50 }
  0x2f   :  { %302 = vst [vmem:[%s808_s3 + $0x1a0] sm:$0xff] %v167_v50  ;;  %v212_v50 = vrot.slane %v112_v45, 6  ;;  %v211_v52 = vsel %vm153_vm0, %v202_v35, %v210_v47 }
  0x30   :  { %267 = vst [vmem:[%s808_s3 + $0x68] sm:$0xff] %v169_v53 }
  0x31   :  { %303 = vst [vmem:[%s808_s3 + $0x1a8] sm:$0xff] %v169_v53  ;;  %v214_v53 = vrot.slane %v113_v48, 6  ;;  %v213_v55 = vsel %vm153_vm0, %v204_v38, %v212_v50  ;;  %v221_v63 = vsel %vm153_vm0, %v212_v50, %v220_v61 }
  0x32   :  { %268 = vst [vmem:[%s808_s3 + $0x70] sm:$0xff] %v171_v56 }
  0x33   :  { %304 = vst [vmem:[%s808_s3 + $0x1b0] sm:$0xff] %v171_v56  ;;  %v216_v56 = vrot.slane %v114_v51, 6  ;;  %v215_v58 = vsel %vm153_vm0, %v206_v41, %v214_v53 }
  0x34   :  { %269 = vst [vmem:[%s808_s3 + $0x78] sm:$0xff] %v173_v59 }
  0x35   :  { %305 = vst [vmem:[%s808_s3 + $0x1b8] sm:$0xff] %v173_v59  ;;  %v218_v59 = vrot.slane %v115_v54, 6  ;;  %v217_v60 = vsel %vm153_vm0, %v208_v44, %v216_v56 }
  0x36   :  { %270 = vst [vmem:[%s808_s3 + $0x80] sm:$0xff] %v175_v62 }
  0x37   :  { %306 = vst [vmem:[%s808_s3 + $0x1c0] sm:$0xff] %v175_v62  ;;  %v219_v62 = vsel %vm153_vm0, %v210_v47, %v218_v59 }
  0x38   :  { %271 = vst [vmem:[%s808_s3 + $0x88] sm:$0xff] %v177_v1 }
  0x39   :  { %307 = vst [vmem:[%s808_s3 + $0x1c8] sm:$0xff] %v177_v1 }
  0x3a   :  { %272 = vst [vmem:[%s808_s3 + $0x90] sm:$0xff] %v179_v4 }
  0x3b   :  { %308 = vst [vmem:[%s808_s3 + $0x1d0] sm:$0xff] %v179_v4 }
  0x3c   :  { %273 = vst [vmem:[%s808_s3 + $0x98] sm:$0xff] %v181_v7 }
  0x3d   :  { %309 = vst [vmem:[%s808_s3 + $0x1d8] sm:$0xff] %v181_v7 }
  0x3e   :  { %274 = vst [vmem:[%s808_s3 + $0xa0] sm:$0xff] %v183_v10 }
  0x3f   :  { %310 = vst [vmem:[%s808_s3 + $0x1e0] sm:$0xff] %v183_v10 }
  0x40   :  { %275 = vst [vmem:[%s808_s3 + $0xa8] sm:$0xff] %v185_v13 }
  0x41   :  { %311 = vst [vmem:[%s808_s3 + $0x1e8] sm:$0xff] %v185_v13 }
  0x42   :  { %276 = vst [vmem:[%s808_s3 + $0xb0] sm:$0xff] %v187_v16 }
  0x43   :  { %312 = vst [vmem:[%s808_s3 + $0x1f0] sm:$0xff] %v187_v16 }
  0x44   :  { %277 = vst [vmem:[%s808_s3 + $0xb8] sm:$0xff] %v189_v19 }
  0x45   :  { %313 = vst [vmem:[%s808_s3 + $0x1f8] sm:$0xff] %v189_v19 }
  0x46   :  { %278 = vst [vmem:[%s808_s3 + $0xc0] sm:$0xff] %v191_v22 }
  0x47   :  { %314 = vst [vmem:[%s808_s3 + $0x200] sm:$0xff] %v191_v22 }
  0x48   :  { %279 = vst [vmem:[%s808_s3 + $0xc8] sm:$0xff] %v193_v25 }
  0x49   :  { %315 = vst [vmem:[%s808_s3 + $0x208] sm:$0xff] %v193_v25 }
  0x4a   :  { %280 = vst [vmem:[%s808_s3 + $0xd0] sm:$0xff] %v195_v28 }
  0x4b   :  { %316 = vst [vmem:[%s808_s3 + $0x210] sm:$0xff] %v195_v28 }
  0x4c   :  { %281 = vst [vmem:[%s808_s3 + $0xd8] sm:$0xff] %v197_v31 }
  0x4d   :  { %317 = vst [vmem:[%s808_s3 + $0x218] sm:$0xff] %v197_v31 }
  0x4e   :  { %282 = vst [vmem:[%s808_s3 + $0xe0] sm:$0xff] %v199_v34 }
  0x4f   :  { %318 = vst [vmem:[%s808_s3 + $0x220] sm:$0xff] %v199_v34 }
  0x50   :  { %283 = vst [vmem:[%s808_s3 + $0xe8] sm:$0xff] %v201_v37 }
  0x51   :  { %319 = vst [vmem:[%s808_s3 + $0x228] sm:$0xff] %v201_v37 }
  0x52   :  { %284 = vst [vmem:[%s808_s3 + $0xf0] sm:$0xff] %v203_v40 }
  0x53   :  { %320 = vst [vmem:[%s808_s3 + $0x230] sm:$0xff] %v203_v40 }
  0x54   :  { %285 = vst [vmem:[%s808_s3 + $0xf8] sm:$0xff] %v205_v43 }
  0x55   :  { %321 = vst [vmem:[%s808_s3 + $0x238] sm:$0xff] %v205_v43 }
  0x56   :  { %286 = vst [vmem:[%s808_s3 + $0x100] sm:$0xff] %v207_v46 }
  0x57   :  { %322 = vst [vmem:[%s808_s3 + $0x240] sm:$0xff] %v207_v46 }
  0x58   :  { %287 = vst [vmem:[%s808_s3 + $0x108] sm:$0xff] %v209_v49 }
  0x59   :  { %323 = vst [vmem:[%s808_s3 + $0x248] sm:$0xff] %v209_v49 }
  0x5a   :  { %288 = vst [vmem:[%s808_s3 + $0x110] sm:$0xff] %v211_v52 }
  0x5b   :  { %324 = vst [vmem:[%s808_s3 + $0x250] sm:$0xff] %v211_v52 }
  0x5c   :  { %289 = vst [vmem:[%s808_s3 + $0x118] sm:$0xff] %v213_v55 }
  0x5d   :  { %325 = vst [vmem:[%s808_s3 + $0x258] sm:$0xff] %v213_v55 }
  0x5e   :  { %290 = vst [vmem:[%s808_s3 + $0x120] sm:$0x1f] %v215_v58 }
  0x5f   :  { %326 = vst [vmem:[%s808_s3 + $0x260] sm:$0x1f] %v215_v58 }
  0x60   :  { %291 = vst [vmem:[%s808_s3 + $0x128] sm:$0x1f] %v217_v60 }
  0x61   :  { %327 = vst [vmem:[%s808_s3 + $0x268] sm:$0x1f] %v217_v60 }
  0x62   :  { %292 = vst [vmem:[%s808_s3 + $0x130] sm:$0x1f] %v219_v62 }
  0x63   :  { %328 = vst [vmem:[%s808_s3 + $0x270] sm:$0x1f] %v219_v62 }
  0x64   :  { %293 = vst [vmem:[%s808_s3 + $0x138] sm:$0x1f] %v221_v63 }
  0x65   :  { %329 = vst [vmem:[%s808_s3 + $0x278] sm:$0x1f] %v221_v63 }

</bundles_post_ra>
